<compile_context>
chip_gen: v7x
topology: tpu7x:2x2x1
jax: 0.10.0
libtpu: 0.0.40
codegen_flags: <defaults>
</compile_context>

<pallas_src>
import functools

import jax
import jax.numpy as jnp
from jax import lax
from jax.experimental import pallas as pl
from jax.experimental.pallas import tpu as pltpu


_MAX_UNROLLED_CHUNKS = 64  # static-unroll bound for the per-step chunk loop


def _fc_epilogue(avg, mx, w1_ref, w2_ref, out_ref, bn):
    """Fused fc(avg) + fc(max) -> sigmoid, written to out_ref ((bn, C))."""
    pooled = jnp.concatenate([avg, mx], axis=0)                     # (2bn, C)
    w1 = w1_ref[...].astype(jnp.float32)                            # (Ch, C)
    w2 = w2_ref[...].astype(jnp.float32)                            # (C, Ch)
    h = lax.dot_general(pooled, w1, (((1,), (1,)), ((), ())),
                        preferred_element_type=jnp.float32)         # (2bn, Ch)
    h = jnp.maximum(h, 0.0)                                         # ReLU
    h = h[:bn] + h[bn:]                                             # (bn, Ch)
    out = lax.dot_general(h, w2, (((1,), (1,)), ((), ())),
                          preferred_element_type=jnp.float32)       # (bn, C)
    out_ref[...] = jax.nn.sigmoid(out).astype(out_ref.dtype)


def _ca_kernel_lanes(x_ref, w1_ref, w2_ref, out_ref, sum_acc, max_acc,
                     *, inv_hw, bn, n_chunks):
    # Fast path: HW (and the spatial tile) are multiples of 128.
    # x_ref:   (bn, C, t_hw)     spatial flattened onto the lane axis
    # sum_acc: (bn, C, 128) f32  lane-shaped running sum   (VPU-only accumulate)
    # max_acc: (bn, C, 128) x.dt lane-shaped running max   (no full-block cast)
    k = pl.program_id(1)

    @pl.when(k == 0)
    def _():
        sum_acc[...] = jnp.zeros_like(sum_acc)
        max_acc[...] = jnp.full_like(max_acc, -jnp.inf)

    def accum(offset):
        chunk = x_ref[:, :, pl.ds(offset, 128)]                     # (bn,C,128)
        sum_acc[...] += chunk.astype(jnp.float32)
        max_acc[...] = jnp.maximum(max_acc[...], chunk)

    if n_chunks <= _MAX_UNROLLED_CHUNKS:
        for i in range(n_chunks):
            accum(i * 128)
    else:
        @pl.loop(0, n_chunks)
        def _(i):
            accum(pl.multiple_of(i * 128, 128))

    @pl.when(k == pl.num_programs(1) - 1)
    def _():
        # Single cross-lane (XLU) reduce + relayout, once per batch group.
        avg = jnp.sum(sum_acc[...], axis=-1) * inv_hw                # (bn, C)
        mx = jnp.max(max_acc[...].astype(jnp.float32), axis=-1)      # (bn, C)
        _fc_epilogue(avg, mx, w1_ref, w2_ref, out_ref, bn)


def _ca_kernel_flat(x_ref, w1_ref, w2_ref, out_ref, sum_acc, max_acc,
                    *, inv_hw, bn):
    # Fallback for HW % 128 != 0 (block spans the full spatial extent).
    k = pl.program_id(1)

    @pl.when(k == 0)
    def _():
        sum_acc[...] = jnp.zeros_like(sum_acc)
        max_acc[...] = jnp.full_like(max_acc, -jnp.inf)

    xb = x_ref[...]                                                  # (bn,C,t_hw)
    sum_acc[...] += jnp.sum(xb.astype(jnp.float32), axis=-1)
    max_acc[...] = jnp.maximum(max_acc[...],
                               jnp.max(xb, axis=-1).astype(jnp.float32))

    @pl.when(k == pl.num_programs(1) - 1)
    def _():
        _fc_epilogue(sum_acc[...] * inv_hw, max_acc[...],
                     w1_ref, w2_ref, out_ref, bn)


def _vmem_limit_bytes():
    """Per-generation scoped-VMEM limit (v7x: 64 MiB phys; v5e/v6e: 128 MiB)."""
    cap = 64 * 1024 * 1024  # conservative fallback (v7x per-core VMEM)
    try:
        cap = int(pltpu.get_tpu_info().vmem_capacity_bytes)
    except Exception:
        pass
    return max(16 * 1024 * 1024, min(cap * 5 // 8, 96 * 1024 * 1024))


def _pick_tiles(N, C, HW, Ch, itemsize, vmem_limit):
    """Pick (bn, t_hw): bn divides N (prefer >=2 parallel grid iterations for
    v7x's two cores), t_hw divides HW; blocks pushed toward multi-MiB size."""
    lane_ok = (HW % 128 == 0)
    per_buf_cap = 16 * 1024 * 1024

    divisors_n = [d for d in range(1, N + 1) if N % d == 0]
    bn_cands = [d for d in divisors_n if N // d >= 2] or divisors_n

    if lane_ok:
        t_max = min(HW, 128 * _MAX_UNROLLED_CHUNKS)
        t_cands = [t for t in range(128, t_max + 1, 128) if HW % t == 0]
    else:
        t_cands = [HW]

    w_dbl = 4 * C * Ch * itemsize  # two weight tensors, double-buffered

    def fits(bn, t):
        block = bn * C * t * itemsize
        if block > per_buf_cap:
            return False
        acc = bn * C * 128 * (4 + itemsize) if lane_ok else 8 * bn * C
        return 2 * block + acc + w_dbl + (1 << 20) <= vmem_limit

    best = None
    for bn in bn_cands:
        for t in t_cands:
            if not fits(bn, t):
                continue
            key = (bn * t, bn)     # maximize block size, then batch rows
            if best is None or key > best[0]:
                best = (key, bn, t)
    if best is None:
        return min(bn_cands), min(t_cands)
    return best[1], best[2]


def channel_attention(x_nchw, w1, w2, *, hw_tile=None):
    """x_nchw: (N, C, H, W); w1: (Ch, C, 1, 1); w2: (C, Ch, 1, 1).
    Returns (N, C, 1, 1), matching the PyTorch module."""
    N, C, H, W = x_nchw.shape
    Ch = w1.shape[0]
    HW = H * W
    itemsize = x_nchw.dtype.itemsize

    vmem_limit = _vmem_limit_bytes()
    bn, t_hw = _pick_tiles(N, C, HW, Ch, itemsize, vmem_limit)
    if hw_tile is not None:
        assert HW % hw_tile == 0 and (hw_tile % 128 == 0 or hw_tile == HW)
        t_hw = hw_tile

    G = N // bn
    grid = (G, HW // t_hw)

    # Free layout glue: NCHW -> (G, bn, C, HW); 1x1 conv weights -> matrices.
    x = x_nchw.reshape(G, bn, C, HW)
    w1m = w1.reshape(Ch, C)
    w2m = w2.reshape(C, Ch)

    lane_ok = (HW % 128 == 0) and (t_hw % 128 == 0)
    if lane_ok:
        kernel = functools.partial(_ca_kernel_lanes, inv_hw=1.0 / HW, bn=bn,
                                   n_chunks=t_hw // 128)
        scratch = [pltpu.VMEM((bn, C, 128), jnp.float32),    # running sum
                   pltpu.VMEM((bn, C, 128), x.dtype)]        # running max
    else:
        kernel = functools.partial(_ca_kernel_flat, inv_hw=1.0 / HW, bn=bn)
        scratch = [pltpu.VMEM((bn, C), jnp.float32),
                   pltpu.VMEM((bn, C), jnp.float32)]

    cost = pl.CostEstimate(
        flops=2 * N * C * HW + 8 * N * C * Ch,
        transcendentals=N * C,
        bytes_accessed=(x.size * itemsize
                        + w1m.size * w1m.dtype.itemsize
                        + w2m.size * w2m.dtype.itemsize
                        + N * C * 4),
    )

    out = pl.pallas_call(
        kernel,
        out_shape=jax.ShapeDtypeStruct((G, bn, C), jnp.float32),
        grid_spec=pltpu.PrefetchScalarGridSpec(
            num_scalar_prefetch=0,
            grid=grid,
            in_specs=[
                # Leading grid dim squeezed; last-two dims are full-extent /
                # 128-aligned for any bn, so the (8,128) rule always holds.
                pl.BlockSpec((None, bn, C, t_hw), lambda g, k: (g, 0, 0, k)),
                pl.BlockSpec((Ch, C), lambda g, k: (0, 0)),
                pl.BlockSpec((C, Ch), lambda g, k: (0, 0)),
            ],
            out_specs=pl.BlockSpec((None, bn, C), lambda g, k: (g, 0, 0)),
            scratch_shapes=scratch,
        ),
        compiler_params=pltpu.CompilerParams(
            dimension_semantics=("parallel", "arbitrary"),
            vmem_limit_bytes=vmem_limit),
        cost_estimate=cost,
    )(x, w1m, w2m)

    return out.astype(x_nchw.dtype).reshape(N, C, 1, 1)


def _reference(x_nchw, w1, w2):
    # Pure-JAX reference reproducing the PyTorch forward.
    N, C, H, W = x_nchw.shape
    Ch = w1.shape[0]
    avg = jnp.mean(x_nchw, axis=(2, 3))           # (N, C)
    mx = jnp.max(x_nchw, axis=(2, 3))             # (N, C)
    w1m = w1.reshape(Ch, C)
    w2m = w2.reshape(C, Ch)

    def fc(v):
        return jnp.maximum(v @ w1m.T, 0.0) @ w2m.T

    return jax.nn.sigmoid(fc(avg) + fc(mx)).reshape(N, C, 1, 1)


if __name__ == "__main__":
    # Small shapes consistent with the module: in_planes=32, ratio=4 -> hidden=8.
    N, C, H, W = 2, 32, 16, 16
    ratio = 4
    Ch = C // ratio

    key = jax.random.PRNGKey(0)
    kx, k1, k2, kx2 = jax.random.split(key, 4)
    x = jax.random.normal(kx, (N, C, H, W), dtype=jnp.float32)
    # Deterministic "kaiming-ish" init for the two 1x1 conv weights (no bias).
    w1 = jax.random.normal(k1, (Ch, C, 1, 1), dtype=jnp.float32) * (2.0 / C) ** 0.5
    w2 = jax.random.normal(k2, (C, Ch, 1, 1), dtype=jnp.float32) * (2.0 / Ch) ** 0.5

    ref = _reference(x, w1, w2)

    # Default tiling (single spatial step at this small shape).
    out = jax.block_until_ready(channel_attention(x, w1, w2))
    assert out.shape == (N, C, 1, 1)
    assert jnp.allclose(out, ref, atol=1e-5, rtol=1e-5), "mismatch vs reference"

    # Force a 128-wide spatial tile so the multi-step accumulation path
    # (pl.when init / accumulate / finalize across the 'arbitrary' axis)
    # of the lane-shaped accumulators is exercised too.
    out_tiled = jax.block_until_ready(channel_attention(x, w1, w2, hw_tile=128))
    assert jnp.allclose(out_tiled, ref, atol=1e-5, rtol=1e-5), "tiled mismatch"

    # Odd spatial size (HW % 128 != 0): exercises the full-extent fallback.
    x_odd = jax.random.normal(kx2, (N, C, 15, 15), dtype=jnp.float32)
    ref_odd = _reference(x_odd, w1, w2)
    out_odd = jax.block_until_ready(channel_attention(x_odd, w1, w2))
    assert jnp.allclose(out_odd, ref_odd, atol=1e-5, rtol=1e-5), "odd-HW mismatch"

    print("KERNEL_OK")
</pallas_src>

<mosaic_0001>
module attributes {stable_mosaic.version = 11 : i64} {
  func.func @_ca_kernel_lanes(%arg0: i32, %arg1: i32, %arg2: memref<1x1x32x256xf32, #tpu.memory_space<vmem>>, %arg3: memref<8x32xf32, #tpu.memory_space<vmem>>, %arg4: memref<32x8xf32, #tpu.memory_space<vmem>>, %arg5: memref<1x1x32xf32, #tpu.memory_space<vmem>>, %arg6: memref<1x32x128xf32, #tpu.memory_space<vmem>>, %arg7: memref<1x32x128xf32, #tpu.memory_space<vmem>>) attributes {dimension_semantics = [#tpu.dimension_semantics<parallel>, #tpu.dimension_semantics<arbitrary>], iteration_bounds = array<i64: 2, 1>, scalar_prefetch = 0 : i64, scratch_operands = 2 : i64, tpu.core_type = #tpu.core_type<tc>, window_params = [{transform_indices = @transform_0, window_bounds = array<i64: 1, 1, 32, 256>}, {pipeline_mode = #tpu.pipeline_mode<synchronous>, transform_indices = @transform_1, window_bounds = array<i64: 8, 32>}, {pipeline_mode = #tpu.pipeline_mode<synchronous>, transform_indices = @transform_2, window_bounds = array<i64: 32, 8>}, {transform_indices = @transform_3, window_bounds = array<i64: 1, 1, 32>}]} {
    %c0_i32 = arith.constant 0 : i32
    %0 = arith.cmpi eq, %arg1, %c0_i32 : i32
    %1 = arith.extui %0 : i1 to i32
    %c0_i32_0 = arith.constant 0 : i32
    %2 = arith.cmpi ne, %1, %c0_i32_0 : i32
    scf.if %2 {
      %cst = arith.constant 0.000000e+00 : f32
      %22 = vector.broadcast %cst : f32 to vector<1x32x128xf32>
      %c0_33 = arith.constant 0 : index
      %c0_34 = arith.constant 0 : index
      %c0_35 = arith.constant 0 : index
      %23 = vector.load %arg6[%c0_33, %c0_34, %c0_35] : memref<1x32x128xf32, #tpu.memory_space<vmem>>, vector<1x32x128xf32>
      tpu.vector_store %arg6[%c0_33, %c0_34, %c0_35], %22 {strides = array<i32>} : memref<1x32x128xf32, #tpu.memory_space<vmem>>, vector<1x32x128xf32>,
      %cst_36 = arith.constant 0xFF800000 : f32
      %24 = vector.broadcast %cst_36 : f32 to vector<1x32x128xf32>
      %c0_37 = arith.constant 0 : index
      %c0_38 = arith.constant 0 : index
      %c0_39 = arith.constant 0 : index
      %25 = vector.load %arg7[%c0_37, %c0_38, %c0_39] : memref<1x32x128xf32, #tpu.memory_space<vmem>>, vector<1x32x128xf32>
      tpu.vector_store %arg7[%c0_37, %c0_38, %c0_39], %24 {strides = array<i32>} : memref<1x32x128xf32, #tpu.memory_space<vmem>>, vector<1x32x128xf32>,
    } else {
    }
    %c0 = arith.constant 0 : index
    %c0_1 = arith.constant 0 : index
    %c0_2 = arith.constant 0 : index
    %c0_3 = arith.constant 0 : index
    %3 = vector.load %arg2[%c0, %c0_1, %c0_2, %c0_3] : memref<1x1x32x256xf32, #tpu.memory_space<vmem>>, vector<1x1x32x128xf32>
    %4 = vector.shape_cast %3 : vector<1x1x32x128xf32> to vector<1x32x128xf32>
    %c0_4 = arith.constant 0 : index
    %c0_5 = arith.constant 0 : index
    %c0_6 = arith.constant 0 : index
    %5 = vector.load %arg6[%c0_4, %c0_5, %c0_6] : memref<1x32x128xf32, #tpu.memory_space<vmem>>, vector<1x32x128xf32>
    %6 = arith.addf %5, %4 : vector<1x32x128xf32>
    %c0_7 = arith.constant 0 : index
    %c0_8 = arith.constant 0 : index
    %c0_9 = arith.constant 0 : index
    %7 = vector.load %arg6[%c0_7, %c0_8, %c0_9] : memref<1x32x128xf32, #tpu.memory_space<vmem>>, vector<1x32x128xf32>
    tpu.vector_store %arg6[%c0_7, %c0_8, %c0_9], %6 {strides = array<i32>} : memref<1x32x128xf32, #tpu.memory_space<vmem>>, vector<1x32x128xf32>,
    %c0_10 = arith.constant 0 : index
    %c0_11 = arith.constant 0 : index
    %c0_12 = arith.constant 0 : index
    %8 = vector.load %arg7[%c0_10, %c0_11, %c0_12] : memref<1x32x128xf32, #tpu.memory_space<vmem>>, vector<1x32x128xf32>
    %9 = arith.maximumf %8, %4 : vector<1x32x128xf32>
    %c0_13 = arith.constant 0 : index
    %c0_14 = arith.constant 0 : index
    %c0_15 = arith.constant 0 : index
    %10 = vector.load %arg7[%c0_13, %c0_14, %c0_15] : memref<1x32x128xf32, #tpu.memory_space<vmem>>, vector<1x32x128xf32>
    tpu.vector_store %arg7[%c0_13, %c0_14, %c0_15], %9 {strides = array<i32>} : memref<1x32x128xf32, #tpu.memory_space<vmem>>, vector<1x32x128xf32>,
    %c0_16 = arith.constant 0 : index
    %c0_17 = arith.constant 0 : index
    %c0_18 = arith.constant 0 : index
    %c128 = arith.constant 128 : index
    %11 = vector.load %arg2[%c0_16, %c0_17, %c0_18, %c128] : memref<1x1x32x256xf32, #tpu.memory_space<vmem>>, vector<1x1x32x128xf32>
    %12 = vector.shape_cast %11 : vector<1x1x32x128xf32> to vector<1x32x128xf32>
    %c0_19 = arith.constant 0 : index
    %c0_20 = arith.constant 0 : index
    %c0_21 = arith.constant 0 : index
    %13 = vector.load %arg6[%c0_19, %c0_20, %c0_21] : memref<1x32x128xf32, #tpu.memory_space<vmem>>, vector<1x32x128xf32>
    %14 = arith.addf %13, %12 : vector<1x32x128xf32>
    %c0_22 = arith.constant 0 : index
    %c0_23 = arith.constant 0 : index
    %c0_24 = arith.constant 0 : index
    %15 = vector.load %arg6[%c0_22, %c0_23, %c0_24] : memref<1x32x128xf32, #tpu.memory_space<vmem>>, vector<1x32x128xf32>
    tpu.vector_store %arg6[%c0_22, %c0_23, %c0_24], %14 {strides = array<i32>} : memref<1x32x128xf32, #tpu.memory_space<vmem>>, vector<1x32x128xf32>,
    %c0_25 = arith.constant 0 : index
    %c0_26 = arith.constant 0 : index
    %c0_27 = arith.constant 0 : index
    %16 = vector.load %arg7[%c0_25, %c0_26, %c0_27] : memref<1x32x128xf32, #tpu.memory_space<vmem>>, vector<1x32x128xf32>
    %17 = arith.maximumf %16, %12 : vector<1x32x128xf32>
    %c0_28 = arith.constant 0 : index
    %c0_29 = arith.constant 0 : index
    %c0_30 = arith.constant 0 : index
    %18 = vector.load %arg7[%c0_28, %c0_29, %c0_30] : memref<1x32x128xf32, #tpu.memory_space<vmem>>, vector<1x32x128xf32>
    tpu.vector_store %arg7[%c0_28, %c0_29, %c0_30], %17 {strides = array<i32>} : memref<1x32x128xf32, #tpu.memory_space<vmem>>, vector<1x32x128xf32>,
    %c0_i32_31 = arith.constant 0 : i32
    %19 = arith.cmpi eq, %arg1, %c0_i32_31 : i32
    %20 = arith.extui %19 : i1 to i32
    %c0_i32_32 = arith.constant 0 : i32
    %21 = arith.cmpi ne, %20, %c0_i32_32 : i32
    scf.if %21 {
      %c0_33 = arith.constant 0 : index
      %c0_34 = arith.constant 0 : index
      %c0_35 = arith.constant 0 : index
      %22 = vector.load %arg6[%c0_33, %c0_34, %c0_35] : memref<1x32x128xf32, #tpu.memory_space<vmem>>, vector<1x32x128xf32>
      %cst = arith.constant dense<0.000000e+00> : vector<1x32xf32>
      %23 = vector.multi_reduction <add>, %22, %cst [2] : vector<1x32x128xf32> to vector<1x32xf32>
      %cst_36 = arith.constant 3.906250e-03 : f32
      %24 = vector.broadcast %cst_36 : f32 to vector<1x32xf32>
      %25 = arith.mulf %23, %24 : vector<1x32xf32>
      %c0_37 = arith.constant 0 : index
      %c0_38 = arith.constant 0 : index
      %c0_39 = arith.constant 0 : index
      %26 = vector.load %arg7[%c0_37, %c0_38, %c0_39] : memref<1x32x128xf32, #tpu.memory_space<vmem>>, vector<1x32x128xf32>
      %cst_40 = arith.constant dense<0xFF800000> : vector<1x32xf32>
      %27 = vector.multi_reduction <maximumf>, %26, %cst_40 [2] : vector<1x32x128xf32> to vector<1x32xf32>
      %28 = tpu.concatenate %25, %27 in 0 : vector<1x32xf32>, vector<1x32xf32> -> vector<2x32xf32>
      %c0_41 = arith.constant 0 : index
      %c0_42 = arith.constant 0 : index
      %29 = vector.load %arg3[%c0_41, %c0_42] : memref<8x32xf32, #tpu.memory_space<vmem>>, vector<8x32xf32>
      %c0_43 = arith.constant 0 : index
      %c0_44 = arith.constant 0 : index
      %30 = vector.load %arg4[%c0_43, %c0_44] : memref<32x8xf32, #tpu.memory_space<vmem>>, vector<32x8xf32>
      %cst_45 = arith.constant dense<0.000000e+00> : vector<2x8xf32>
      %31 = tpu.matmul %28, %29, %cst_45 {dimension_numbers = #tpu.dot_dimension_numbers<[1], [1], [0], [0], [0, 0, 1, 0], [], []>} : vector<2x32xf32>, vector<8x32xf32>, vector<2x8xf32> -> vector<2x8xf32>
      %cst_46 = arith.constant 0.000000e+00 : f32
      %32 = vector.broadcast %cst_46 : f32 to vector<2x8xf32>
      %33 = arith.maximumf %31, %32 : vector<2x8xf32>
      %34 = vector.extract_strided_slice %33 {offsets = [0, 0], sizes = [1, 8], strides = [1, 1]} : vector<2x8xf32> to vector<1x8xf32>
      %35 = vector.extract_strided_slice %33 {offsets = [1, 0], sizes = [1, 8], strides = [1, 1]} : vector<2x8xf32> to vector<1x8xf32>
      %36 = arith.addf %34, %35 : vector<1x8xf32>
      %cst_47 = arith.constant dense<0.000000e+00> : vector<1x32xf32>
      %37 = tpu.matmul %36, %30, %cst_47 {dimension_numbers = #tpu.dot_dimension_numbers<[1], [1], [0], [0], [0, 0, 1, 0], [], []>} : vector<1x8xf32>, vector<32x8xf32>, vector<1x32xf32> -> vector<1x32xf32>
      %38 = arith.negf %37 : vector<1x32xf32>
      %39 = math.exp %38 : vector<1x32xf32>
      %cst_48 = arith.constant 1.000000e+00 : f32
      %40 = vector.broadcast %cst_48 : f32 to vector<1x32xf32>
      %41 = arith.addf %40, %39 : vector<1x32xf32>
      %42 = arith.divf %40, %41 : vector<1x32xf32>
      %c0_49 = arith.constant 0 : index
      %c0_50 = arith.constant 0 : index
      %c0_51 = arith.constant 0 : index
      %43 = vector.load %arg5[%c0_49, %c0_50, %c0_51] : memref<1x1x32xf32, #tpu.memory_space<vmem>>, vector<1x1x32xf32>
      %44 = vector.shape_cast %43 : vector<1x1x32xf32> to vector<1x32xf32>
      %45 = vector.shape_cast %42 : vector<1x32xf32> to vector<1x1x32xf32>
      tpu.vector_store %arg5[%c0_49, %c0_50, %c0_51], %45 {strides = array<i32>} : memref<1x1x32xf32, #tpu.memory_space<vmem>>, vector<1x1x32xf32>,
    } else {
    }
    return
  }
  func.func @transform_0(%arg0: i32, %arg1: i32) -> (i32, i32, i32, i32) {
    %c0_i32 = arith.constant 0 : i32
    %c0_i32_0 = arith.constant 0 : i32
    %c0_i32_1 = arith.constant 0 : i32
    return %arg0, %c0_i32, %c0_i32_0, %arg1 : i32, i32, i32, i32
  }
  func.func @transform_1(%arg0: i32, %arg1: i32) -> (i32, i32) {
    %c0_i32 = arith.constant 0 : i32
    %c0_i32_0 = arith.constant 0 : i32
    %c0_i32_1 = arith.constant 0 : i32
    return %c0_i32, %c0_i32_0 : i32, i32
  }
  func.func @transform_2(%arg0: i32, %arg1: i32) -> (i32, i32) {
    %c0_i32 = arith.constant 0 : i32
    %c0_i32_0 = arith.constant 0 : i32
    %c0_i32_1 = arith.constant 0 : i32
    return %c0_i32, %c0_i32_0 : i32, i32
  }
  func.func @transform_3(%arg0: i32, %arg1: i32) -> (i32, i32, i32) {
    %c0_i32 = arith.constant 0 : i32
    %c0_i32_0 = arith.constant 0 : i32
    %c0_i32_1 = arith.constant 0 : i32
    return %arg0, %c0_i32, %c0_i32_0 : i32, i32, i32
  }
}

</mosaic_0001>

<bundles_post_ra>
// kernel: tpu_custom_call.1
= control target key start
LH: loop header
LB: loop body
LE: loop exit
PB: predicated region body
PF: predicated region fallthrough
CT: control target
= control target key end

     0   :  { %8 = vsyncpa [#allocation5], 0  ;;  %s1101_s0 = inlined_call_operand.hbm [shape: f32[2,1,32,256], index: 0, kind: input, shape index: {}]   ;;  %s1102_s1 = inlined_call_operand.vmem [shape: f32[8,32], index: 1, kind: input, shape index: {}]   ;;  %s1103_s2 = inlined_call_operand.vmem [shape: f32[32,8], index: 2, kind: input, shape index: {}]   ;;  %s1104_s3 = inlined_call_operand.hbm [shape: f32[2,1,32], index: 3, kind: output, shape index: {}]  }
   0x1   :  { %10 = vsyncpa [#allocation5 + $0x1], 0 }
   0x2   :  { %11 = vsyncpa [#allocation6], 0 }
   0x3   :  { %13 = vsyncpa [#allocation6 + $0x1], 0  ;;  %s897_s12 = smov 0   ;;  %s899_s13 = smov 0  }
   0x4   :  { %s901_s14 = smov 0   ;;  %s903_s15 = smov 0  }
   0x5   :  { %s905_s16 = smov 0   ;;  %s907_s17 = smov 0  }
   0x6 LB: > { %s633_s18 = sadd.s32 4294967295, %s868_s17   ;;  %s634_s19 = sadd.s32 4294967294, %s868_s17   ;;  %s868_s17 = sphi %s907_s17, %s19_s17   ;;  %s864_s16 = sphi %s905_s16, %s1121_s16   ;;  %s860_s15 = sphi %s903_s15, %s1120_s15   ;;  %s856_s14 = sphi %s901_s14, %s1119_s14   ;;  %s852_s13 = sphi %s899_s13, %s1118_s13   ;;  %s848_s12 = sphi %s897_s12, %s1117_s12  }
   0x7   : > { %s31_s20 = sadd.s32 1, %s864_s16  ;;  %s40_s21 = sadd.s32 1, %s856_s14 }
   0x8   : > { %p33_p0 = scmp.ge.s32.totalorder %s31_s20, 2  ;;  %p47_p1 = scmp.ne.s32.totalorder %s856_s14, %s852_s13 }
   0x9   : > { %p48_p2 = scmp.eq.s32.totalorder %s868_s17, 0  ;;  %p53_p3 = scmp.ne.s32.totalorder %s852_s13, %s848_s12 }
   0xa   : > { %s1123_s20 = smov (%p33_p0, %s31_s20), 0  ;;  %p54_p5 = scmp.eq.s32.totalorder %s633_s18, 0 }
   0xb   : > { %p938_p4 = por %p48_p2, %p47_p1  ;;  %s35_s23 = ssub.s32 %s864_s16, %s1123_s20 }
   0xc   : > { %p119_p6 = scmp.eq.s32.totalorder %s633_s18, 1  ;;  %p38_p7 = scmp.eq.s32.totalorder %s35_s23, 0 }
   0xd   : > { %p944_p8 = por %p54_p5, %p53_p3  ;;  %p125_p10 = scmp.eq.s32.totalorder %s634_s19, 1 }
   0xe   : > { %p948_p9 = por %p119_p6, %p47_p1  ;;  %p697_p13 = scmp.lt.s32.totalorder %s868_s17, 2 }
   0xf   : > { %s953_s26 = scalar_select %p38_p7, %s856_s14, %s40_s21  }
  0x10   : > { %s1108_s25 = scalar_select %p948_p9, 1, 0 }
  0x11   : > { %p955_p11 = por %p125_p10, %p53_p3  ;;  %s151_s28 = sand.u32 1, %s856_s14  }
  0x12   : > { %s637_s29 = sshll.u32 %s151_s28, 6  ;;  %s653_s30 = sshll.u32 %s864_s16, 10 }
  0x13   : > { %s1109_s27 = scalar_select %p955_p11, 1, 0 }
  0x14   : > { %s966_s6 = scalar_lea.hbm %s1101_s0, %s653_s30  ;;  %s155_s7 = scalar_lea.vmem [#allocation4], %s637_s29 }
  0x15   : > { %s164_s8 = sshll.u32 %s155_s7, 4  ;;  %p972_p0 = pnand %p697_p13, %p938_p4  ;;  %s968_s8 = int_to_ptr.vmem [resolvable:$true] %s164_s8 }
  0x16   : > { %s977_s10 = scalar_lea.sflag [#allocation5], %s151_s28  ;;  %s756_s11 = scalar_lea.hbm %s966_s6, 1024 }
  0x17   : > { %p757_p2 = scmp.ne.s32.totalorder %s966_s6, %s756_s11  ;;  %p758_p3 = pneg %p972_p0 }
  0x18   : > { %s761_s21 = scalar_lea.hbm %s1101_s0, 2048  ;;  %p762_p4 = scmp.lt.u32.totalorder %s966_s6, %s1101_s0 }
  0x19   : > { %p759_p5 = pnand %p758_p3, %p757_p2  ;;  %p763_p7 = scmp.lt.u32.totalorder %s761_s21, %s756_s11 }
  0x1a   : > { %p765_p13 = scmp.lt.u32.totalorder %s756_s11, %s966_s6 }
  0x1b   : > { %p760_p6 = pneg %p759_p5  ;;  %p764_p10 = por %p763_p7, %p762_p4 }
  0x1d   : > { %p766_p12 = por %p765_p13, %p764_p10 }
  0x1f   : > { %p767_p1 = pnand %p766_p12, %p760_p6 }
  0x21   : > { %770 = shalt.err (!%p767_p1)
}
  0x22   : > { %s771_s28 = scalar_lea.vmem %s968_s8, 1024  ;;  %s870_s29 = smov [#allocation4]  }
  0x23   : > { %p772_p2 = scmp.ne.s32.totalorder %s968_s8, %s771_s28  ;;  %s776_s30 = sshll.u32 %s870_s29, 4  ;;  %s777_s30 = int_to_ptr.vmem [resolvable:$false] %s776_s30 }
  0x24   : > { %s778_s4 = scalar_lea.vmem %s777_s30, 2048  ;;  %p779_p9 = scmp.lt.s32.totalorder %s968_s8, %s777_s30 }
  0x25   : > { %p774_p5 = pnand %p772_p2, %p758_p3  ;;  %p780_p4 = scmp.lt.s32.totalorder %s778_s4, %s771_s28 }
  0x27   : > { %p775_p11 = pneg %p774_p5  ;;  %p781_p7 = por %p780_p4, %p779_p9 }
  0x29   : > { %p782_p10 = pnand %p781_p7, %p775_p11 }
  0x2b   : > { %785 = shalt.err (!%p782_p10)
}
  0x2c   : > { %s871_s5 = smov 256   ;;  %s872_s7 = smov 16  }
  0x2d   : > { %692 = dma.hbm_to_vmem [thread:$0]  (!%p972_p0), %s966_s6, 1024, %s968_s8, %s977_s10, %s871_s5, %s871_s5, %s872_s7  }
  0x2e   : > { %p172_p12 = scmp.lt.s32.totalorder %s868_s17, 3  ;;  %p1111_p1 = scmp.ge.s32.totalorder %s868_s17, 1 }
  0x30   : > { %p173_p3 = pnand %p1111_p1, %p172_p12 }
  0x31   : > { %s1009_s11 = sand.u32 (!%p173_p3), 1, %s852_s13  }
  0x32   : > { %176 = sbr.rel (%p173_p3) target bundleno = 691 (0x2b3), region = 32  ;;  %s641_s18 = sshll.u32 (!%p173_p3), %s1009_s11, 6 }
  0x33   : > { %s179_s19 = scalar_lea.sflag (!%p173_p3), [#allocation5], %s1009_s11  ;;  %s182_s21 = scalar_lea.vmem (!%p173_p3), [#allocation4], %s641_s18 }
  0x39   : > { %839 = dma.done.wait (%p944_p8), %s179_s19, 1024  }
  0x3a   : > { %841 = vsyncadd (%p944_p8), %s179_s19, 4294966272  ;;  %v219_v0 = vld [vmem:[%s182_s21 + $0x20] sm:$0xff]  ;;  %v247_v1 = vld [vmem:[%s182_s21 + $0x28] sm:$0xff]  ;;  %v873_v16 = vmov 0.0   ;;  %vm367_vm0 = vcmask 261120   ;;  %vm874_vm1 = vmmov 0   ;;  %v308_v23 = vlaneseq }
  0x3b   : > { %v217_v2 = vld [vmem:[%s182_s21] sm:$0xff]  ;;  %v255_v3 = vadd.f32 %v247_v1, %v219_v0  ;;  %v245_v4 = vld [vmem:[%s182_s21 + $0x8] sm:$0xff]  ;;  %v220_v5 = vld [vmem:[%s182_s21 + $0x30] sm:$0xff]  ;;  %v267_v15 = vmax.f32 %v219_v0, %v247_v1  ;;  %661 = vmatprep.subr.mxu0 %v873_v16  ;;  %663 = vmatprep.mubr.msk.f32.mxu0 %vm874_vm1, %v873_v16  ;;  %vm449_vm2 = vcmask 64512   ;;  %v875_v20 = vmov 0.0|0.0   ;;  %s650_s4 = sshll.u32 %s860_s15, 4 }
  0x3c   : > { %v248_v6 = vld [vmem:[%s182_s21 + $0x38] sm:$0xff]  ;;  %v253_v7 = vadd.f32 %v245_v4, %v217_v2  ;;  %v218_v8 = vld [vmem:[%s182_s21 + $0x10] sm:$0xff]  ;;  %v265_v13 = vmax.f32 %v217_v2, %v245_v4  ;;  %v362_v17 = vld [vmem:[%s1102_s1] sm:$0xff]  ;;  %674 = vmatprep.mubr.msk.f32.mxu1 %vm874_vm1, %v873_v16  ;;  %677 = vmatprep.subr.bf16.mxu1 %v875_v20  ;;  %v309_v24 = vand.u32 127, %v308_v23  ;;  %v311_v27 = vshrl.u32 %v308_v23, 7  ;;  %s203_s5 = scalar_lea.vmem [#allocation7], %s1009_s11 }
  0x3d   : > { %v246_v9 = vld [vmem:[%s182_s21 + $0x18] sm:$0xff]  ;;  %284 = vadd.xlane.f32.xlu1 %v255_v3  ;;  %v256_v10 = vadd.f32 %v248_v6, %v220_v5  ;;  %v268_v14 = vmax.f32 %v220_v5, %v248_v6  ;;  %662 = vmatpush3.xpose.msk.msra.mxu0 %vm367_vm0, %v362_v17  ;;  %v363_v18 = vld [vmem:[%s1103_s2] sm:$0xff]  ;;  %v364_v19 = vld [vmem:[%s1103_s2 + $0x8] sm:$0xff]  ;;  %vm319_vm4 = vcmask 130112   ;;  %vm326_vm5 = vcmask 195712   ;;  %s556_s7 = sshll.u32 %s203_s5, 4  ;;  %s1052_s21 = scalar_lea.hbm %s1104_s3, %s650_s4  ;;  %s1054_s7 = int_to_ptr.vmem [resolvable:$true] %s556_s7 }
  0x3e   : > { %280 = vadd.xlane.f32.xlu0 %v253_v7  ;;  %v254_v11 = vadd.f32 %v246_v9, %v218_v8  ;;  %v266_v12 = vmax.f32 %v218_v8, %v246_v9  ;;  %v678_v21 = vpack.c.bf16 %v364_v19, %v363_v18  ;;  %vm1029_vm3 = vmpackc.low %vm449_vm2, %vm449_vm2  ;;  %v314_v26 = vadd.s32 4294967288, %v309_v24  ;;  %v365_v60 = vld [vmem:[%s1103_s2 + $0x10] sm:$0xff]  ;;  %v366_v61 = vld [vmem:[%s1103_s2 + $0x18] sm:$0xff]  ;;  %s544_s24 = scalar_lea.sflag [#allocation6], %s1009_s11  ;;  %s786_s6 = scalar_lea.vmem %s1054_s7, 16 }
  0x3f   : > { %v321_v29 = vadd.s32 4294967280, %v309_v24  ;;  %v312_v32 = vsub.s32 %v309_v24, %v311_v27  ;;  %v328_v34 = vadd.s32 4294967272, %v309_v24  ;;  %vm333_vm6 = vcmask 261312   ;;  %p787_p8 = scmp.ne.s32.totalorder %s1054_s7, %s786_s6  ;;  %p1114_p9 = scmp.ne.s32.totalorder %s1108_s25, 0 }
  0x40   : > { %680 = vmatpush3.bf16.xpose.msk.msra.mxu1 %vm1029_vm3, %v678_v21  ;;  %v317_v31 = vsub.s32 %v314_v26, %v311_v27  ;;  %vm360_vm7 = vcmask 1040384   ;;  %v682_v62 = vpack.c.bf16 %v366_v61, %v365_v60  ;;  %vm541_vm8 = vcmask 253952   ;;  %s876_s15 = smov [#allocation7]  }
  0x41   : > { %286 = vadd.xlane.f32.xlu1 %v256_v10  ;;  %681 = vmatprep.subr.bf16.mxu1 %v875_v20  ;;  %v324_v37 = vsub.s32 %v321_v29, %v311_v27  ;;  %v331_v42 = vsub.s32 %v328_v34, %v311_v27  ;;  %p788_p11 = pnand %p787_p8, %p1114_p9  ;;  %s790_s8 = sshll.u32 %s876_s15, 4  ;;  %s791_s8 = int_to_ptr.vmem [resolvable:$false] %s790_s8 }
  0x42   : > { %282 = vadd.xlane.f32.xlu0 %v254_v11  ;;  %s792_s9 = scalar_lea.vmem %s791_s8, 32  ;;  %p793_p6 = scmp.lt.s32.totalorder %s1054_s7, %s791_s8 }
  0x43   : > { %p789_p0 = pneg %p788_p11  ;;  %p794_p13 = scmp.lt.s32.totalorder %s792_s9, %s786_s6 }
  0x45   : > { %298 = vmax.xlane.f32.xlu1 %v266_v12  ;;  %p795_p2 = por %p794_p13, %p793_p6 }
  0x46   : > { %296 = vmax.xlane.f32.xlu0 %v265_v13 }
  0x47   : > { %p796_p5 = pnand %p795_p2, %p789_p0 }
  0x48   : > { %684 = vmatpush3.bf16.xpose.msk.msra.mxu1 %vm1029_vm3, %v682_v62 }
  0x49   : > { %302 = vmax.xlane.f32.xlu1 %v268_v14 }
  0x4a   : > { %300 = vmax.xlane.f32.xlu0 %v267_v15 }
  0xca   : > { %v285_v25 = vpop.xlane.xlu1 %284 }
  0xcb   : > { %v281_v28 = vpop.xlane.xlu0 %280  ;;  %v290_v38 = vmul.f32 0.00390625, %v285_v25 }
  0xcc   : > { %v288_v33 = vmul.f32 0.00390625, %v281_v28 }
  0xcd   : > { %v325_v48 = vrot.slane %v290_v38, %v324_v37 }
  0xce   : > { %v287_v30 = vpop.xlane.xlu1 %286  ;;  %v313_v41 = vrot.slane %v288_v33, %v312_v32 }
  0xcf   : > { %v283_v35 = vpop.xlane.xlu0 %282  ;;  %v291_v43 = vmul.f32 0.00390625, %v287_v30 }
  0xd0   : > { %v289_v36 = vmul.f32 0.00390625, %v283_v35 }
  0xd1   : > { %v332_v50 = vrot.slane %v291_v43, %v331_v42 }
  0xd2   : > { %v318_v39 = vrot.slane %v289_v36, %v317_v31  ;;  %v299_v40 = vpop.xlane.xlu1 %298 }
  0xd3   : > { %v297_v44 = vpop.xlane.xlu0 %296  ;;  %v347_v46 = vrot.slane %v299_v40, %v317_v31 }
  0xd4   : > { %v320_v45 = vsel %vm319_vm4, %v318_v39, %v313_v41  ;;  %v343_v47 = vrot.slane %v297_v44, %v312_v32 }
  0xd5   : > { %v327_v54 = vsel %vm326_vm5, %v325_v48, %v320_v45 }
  0xd6   : > { %v303_v49 = vpop.xlane.xlu1 %302  ;;  %v348_v55 = vsel %vm319_vm4, %v347_v46, %v343_v47  ;;  %v334_v58 = vsel %vm333_vm6, %v332_v50, %v327_v54 }
  0xd7   : > { %v301_v51 = vpop.xlane.xlu0 %300  ;;  %v357_v52 = vrot.slane %v303_v49, %v331_v42 }
  0xd8   : > { %v352_v53 = vrot.slane %v301_v51, %v324_v37 }
  0xda   : > { %v353_v56 = vsel %vm326_vm5, %v352_v53, %v348_v55 }
  0xdb   : > { %v358_v57 = vsel %vm333_vm6, %v357_v52, %v353_v56 }
  0xdc   : > { %v361_v59 = vsel %vm360_vm7, %v334_v58, %v358_v57 }
  0xdd   : > { %664 = vmatmul.mubr.msk.f32.vlgmr.msra.gmra.mrb[0].mxu0 %vm367_vm0, %v361_v59 }
 0x1b0   : > { %v440_v63 = vpop.f32.mrb[0].mxu0 }
 0x1b1   : > { %v444_v0 = vmax.f32 %v440_v63, 0.0  ;;  %v665_v1 = vpop.f32.mrb[1].mxu0 }
 0x1b3   : > { %v446_v2 = vrot.slane %v444_v0, 1 }
 0x1b5   : > { %v448_v3 = vadd.f32 %v446_v2, %v444_v0 }
 0x1b7   : > { %675 = vmatmul.mubr.msk.f32.vlgmr.msra.gmra.mrb[0].mxu1 %vm449_vm2, %v448_v3 }
 0x28a   : > { %v531_v4 = vpop.f32.mrb[0].mxu1 }
 0x28b   : > { %v649_v5 = vmul.f32 -1.442695, %v531_v4  ;;  %v676_v6 = vpop.f32.mrb[1].mxu1 }
 0x28d   : > { %752 = vpow2.f32 %v649_v5 }
 0x297   : > { %v753_v7 = vpop.eup %752 }
 0x298   : > { %v538_v8 = vadd.f32 1.0, %v753_v7 }
 0x29a   : > { %754 = vrcp.f32 %v538_v8 }
 0x2a4   : > { %v755_v9 = vpop.eup %754 }
 0x2a5   : > { %542 = vst.msk [vmem:[%s203_s5] sm:$0x1] %vm541_vm8, %v755_v9 }
 0x2a6   : > { %799 = shalt.err (!%p796_p5)
}
 0x2a7   : > { %s800_s11 = scalar_lea.hbm %s1052_s21, 16  ;;  %s804_s23 = scalar_lea.hbm %s1104_s3, 32 }
 0x2a8   : > { %p801_p4 = scmp.ne.s32.totalorder %s1052_s21, %s800_s11  ;;  %p805_p12 = scmp.lt.u32.totalorder %s1052_s21, %s1104_s3 }
 0x2a9   : > { %p806_p1 = scmp.lt.u32.totalorder %s804_s23, %s800_s11  ;;  %p808_p8 = scmp.lt.u32.totalorder %s800_s11, %s1052_s21 }
 0x2aa   : > { %p802_p7 = pnand %p801_p4, %p1114_p9 }
 0x2ab   : > { %p807_p3 = por %p806_p1, %p805_p12 }
 0x2ac   : > { %p803_p10 = pneg %p802_p7 }
 0x2ad   : > { %p809_p11 = por %p808_p8, %p807_p3 }
 0x2af   : > { %p810_p0 = pnand %p809_p11, %p803_p10 }
 0x2b1   : > { %813 = shalt.err (!%p810_p0)
}
 0x2b2   : > { %687 = dma.vmem_to_hbm [thread:$0]  (%p1114_p9), %s1054_s7, 16, %s1052_s21, %s544_s24  }
 0x2b3 PF: > { %s568_s30 = sand.u32 1, %s848_s12   ;;  %p1115_p6 = scmp.ne.s32.totalorder %s1109_s27, 0 }
 0x2b4   : > { %p1116_p13 = scmp.ge.s32.totalorder %s868_s17, 2  ;;  %s569_s4 = scalar_lea.sflag [#allocation6], %s568_s30 }
 0x2b6   : > { %p694_p2 = pnand %p1116_p13, %p1115_p6 }
 0x2b8   : > { %843 = dma.done.wait (!%p694_p2), %s569_s4, 16  }
 0x2b9   : > { %845 = vsyncadd (!%p694_p2), %s569_s4, 4294967280  ;;  %s19_s17 = sadd.s32 1, %s868_s17   ;;  %s1117_s12 = smov %s852_s13 }
 0x2ba   : > { %p16_p5 = scmp.ge.s32.totalorder %s19_s17, 4   ;;  %s1118_s13 = smov %s856_s14 }
 0x2bb   : > { %s1119_s14 = smov %s953_s26  ;;  %s1120_s15 = smov %s864_s16 }
 0x2bc   : > { %s1121_s16 = smov %s1123_s20  ;;  %18 = sbr.rel (!%p16_p5) target bundleno = 6 (0x6), region = 85 }
 0x2c3   :  { %573 = vsyncpa [#allocation5], 1 }
 0x2c4   :  { %575 = vsyncpa [#allocation5 + $0x1], 1 }
 0x2c5   :  { %576 = vsyncpa [#allocation6], 1 }
 0x2c6   :  { %578 = vsyncpa [#allocation6 + $0x1], 1 }

</bundles_post_ra>
